<compile_context>
chip_gen: v6e
topology: v6e:2x2x1
jax: 0.10.0
libtpu: 0.0.40
codegen_flags: <defaults>
</compile_context>

<pallas_src>
import jax
import jax.numpy as jnp
from jax.experimental import pallas as pl
from jax.experimental.pallas import tpu as pltpu


# ----------------------------------------------------------------------------
# Fused statistics kernel: one block = (bb, T, D) input -> (bb, 5*D) output
# ----------------------------------------------------------------------------
def _stats_kernel(x_ref, o_ref):
    x = x_ref[...].astype(jnp.float32)          # (bb, T, D), resident in VMEM
    t = x.shape[1]

    last = x[:, t - 1, :]                       # seq[:, -1, :]
    mn = jnp.min(x, axis=1)                     # min over time
    mx = jnp.max(x, axis=1)                     # max over time
    mean = jnp.mean(x, axis=1)                  # mean over time
    # population variance (torch.std_mean(..., unbiased=False))
    var = jnp.mean(jnp.square(x - mean[:, None, :]), axis=1)
    std = jnp.sqrt(var)

    out = jnp.concatenate([last, mn, mx, mean, std], axis=-1)   # (bb, 5*D)
    o_ref[...] = out.astype(o_ref.dtype)        # single lane-dense store


# ----------------------------------------------------------------------------
# Wrapper
# ----------------------------------------------------------------------------
def stats_model_forward(seq, *, batch_tile=None):
    """seq: (B, T, D) batch-first, like the PyTorch module. Returns (B, 5*D)."""
    B, T, D = seq.shape
    out_d = 5 * D

    # Batch tiling: whole batch in one block when small; otherwise a
    # sublane-aligned tile (multiple of 8) so block shapes stay Mosaic-legal.
    if batch_tile is None:
        batch_tile = B if B <= 512 else 512
    if batch_tile < B and (batch_tile % 8 != 0 or B % batch_tile != 0):
        batch_tile = B
    grid = (pl.cdiv(B, batch_tile),)

    return pl.pallas_call(
        _stats_kernel,
        out_shape=jax.ShapeDtypeStruct((B, out_d), seq.dtype),
        grid_spec=pltpu.PrefetchScalarGridSpec(
            num_scalar_prefetch=0,
            grid=grid,
            in_specs=[
                pl.BlockSpec((batch_tile, T, D), lambda i: (i, 0, 0)),
            ],
            out_specs=pl.BlockSpec((batch_tile, out_d), lambda i: (i, 0)),
        ),
        compiler_params=pltpu.CompilerParams(
            # rows are independent -> safe to shard the batch axis across cores
            dimension_semantics=("parallel",),
        ),
    )(seq)


# ----------------------------------------------------------------------------
# Pure-JAX reference (for a cheap in-script correctness check)
# ----------------------------------------------------------------------------
def _stats_reference(seq):
    x = seq.astype(jnp.float32)
    last = x[:, -1, :]
    mn = jnp.min(x, axis=1)
    mx = jnp.max(x, axis=1)
    mean = jnp.mean(x, axis=1)
    std = jnp.sqrt(jnp.mean(jnp.square(x - mean[:, None, :]), axis=1))
    return jnp.concatenate([last, mn, mx, mean, std], axis=-1).astype(seq.dtype)


if __name__ == "__main__":
    B, T, D = 2, 8, 16

    key = jax.random.PRNGKey(0)
    seq = jax.random.normal(key, (B, T, D), dtype=jnp.float32)

    out = stats_model_forward(seq)
    out = jax.block_until_ready(out)

    assert out.shape == (B, 5 * D), out.shape

    ref = jax.block_until_ready(_stats_reference(seq))
    assert jnp.allclose(out, ref, atol=1e-5, rtol=1e-5), (
        float(jnp.max(jnp.abs(out - ref)))
    )

    print("KERNEL_OK")
</pallas_src>

<mosaic_0001>
module attributes {stable_mosaic.version = 11 : i64} {
  func.func @_stats_kernel(%arg0: i32, %arg1: memref<2x8x16xf32, #tpu.memory_space<vmem>>, %arg2: memref<2x80xf32, #tpu.memory_space<vmem>>) attributes {dimension_semantics = [#tpu.dimension_semantics<parallel>], iteration_bounds = array<i64: 1>, scalar_prefetch = 0 : i64, scratch_operands = 0 : i64, tpu.core_type = #tpu.core_type<tc>, window_params = [{transform_indices = @transform_0, window_bounds = array<i64: 2, 8, 16>}, {transform_indices = @transform_1, window_bounds = array<i64: 2, 80>}]} {
    %c0 = arith.constant 0 : index
    %c0_0 = arith.constant 0 : index
    %c0_1 = arith.constant 0 : index
    %0 = vector.load %arg1[%c0, %c0_0, %c0_1] : memref<2x8x16xf32, #tpu.memory_space<vmem>>, vector<2x8x16xf32>
    %1 = vector.extract_strided_slice %0 {offsets = [0, 7, 0], sizes = [2, 1, 16], strides = [1, 1, 1]} : vector<2x8x16xf32> to vector<2x1x16xf32>
    %2 = vector.shape_cast %1 : vector<2x1x16xf32> to vector<2x16xf32>
    %cst = arith.constant dense<0x7F800000> : vector<2x16xf32>
    %3 = vector.multi_reduction <minimumf>, %0, %cst [1] : vector<2x8x16xf32> to vector<2x16xf32>
    %cst_2 = arith.constant dense<0xFF800000> : vector<2x16xf32>
    %4 = vector.multi_reduction <maximumf>, %0, %cst_2 [1] : vector<2x8x16xf32> to vector<2x16xf32>
    %cst_3 = arith.constant dense<0.000000e+00> : vector<2x16xf32>
    %5 = vector.multi_reduction <add>, %0, %cst_3 [1] : vector<2x8x16xf32> to vector<2x16xf32>
    %cst_4 = arith.constant 8.000000e+00 : f32
    %6 = vector.broadcast %cst_4 : f32 to vector<2x16xf32>
    %7 = arith.divf %5, %6 : vector<2x16xf32>
    %8 = vector.shape_cast %7 : vector<2x16xf32> to vector<2x1x16xf32>
    %9 = vector.broadcast %8 : vector<2x1x16xf32> to vector<2x8x16xf32>
    %10 = arith.subf %0, %9 : vector<2x8x16xf32>
    %11 = arith.mulf %10, %10 : vector<2x8x16xf32>
    %cst_5 = arith.constant dense<0.000000e+00> : vector<2x16xf32>
    %12 = vector.multi_reduction <add>, %11, %cst_5 [1] : vector<2x8x16xf32> to vector<2x16xf32>
    %cst_6 = arith.constant 8.000000e+00 : f32
    %13 = vector.broadcast %cst_6 : f32 to vector<2x16xf32>
    %14 = arith.divf %12, %13 : vector<2x16xf32>
    %15 = math.sqrt %14 : vector<2x16xf32>
    %16 = tpu.concatenate %2, %3, %4, %7, %15 in 1 : vector<2x16xf32>, vector<2x16xf32>, vector<2x16xf32>, vector<2x16xf32>, vector<2x16xf32> -> vector<2x80xf32>
    %c0_7 = arith.constant 0 : index
    %c0_8 = arith.constant 0 : index
    %17 = vector.load %arg2[%c0_7, %c0_8] : memref<2x80xf32, #tpu.memory_space<vmem>>, vector<2x80xf32>
    tpu.vector_store %arg2[%c0_7, %c0_8], %16 {strides = array<i32>} : memref<2x80xf32, #tpu.memory_space<vmem>>, vector<2x80xf32>,
    return
  }
  func.func @transform_0(%arg0: i32) -> (i32, i32, i32) {
    %c0_i32 = arith.constant 0 : i32
    %c0_i32_0 = arith.constant 0 : i32
    %c0_i32_1 = arith.constant 0 : i32
    return %arg0, %c0_i32, %c0_i32_0 : i32, i32, i32
  }
  func.func @transform_1(%arg0: i32) -> (i32, i32) {
    %c0_i32 = arith.constant 0 : i32
    %c0_i32_0 = arith.constant 0 : i32
    return %arg0, %c0_i32 : i32, i32
  }
}

</mosaic_0001>

<bundles_post_ra>
// kernel: tpu_custom_call.1
= control target key start
LH: loop header
LB: loop body
LE: loop exit
PB: predicated region body
PF: predicated region fallthrough
CT: control target
= control target key end

     0   :  { %6 = vsyncpa [#allocation3], 0  ;;  %s276_s0 = inlined_call_operand.hbm [shape: f32[2,8,16], index: 0, kind: input, shape index: {}]   ;;  %s277_s1 = inlined_call_operand.hbm [shape: f32[2,80], index: 1, kind: output, shape index: {}]  }
   0x1   :  { %7 = vsyncpa [#allocation4], 0  ;;  %s228_s6 = smov [#allocation2]  }
   0x2   :  { %s13_s7 = sshll.u32 %s228_s6, 4  ;;  %s14_s7 = int_to_ptr.vmem [resolvable:$true] %s13_s7 }
   0x3   :  { %s192_s8 = scalar_lea.vmem %s14_s7, 256  ;;  %p197_p1 = scmp.lt.s32.totalorder %s14_s7, %s14_s7 }
   0x4   :  { %p193_p0 = scmp.ne.s32.totalorder %s14_s7, %s192_s8  ;;  %p198_p2 = scmp.lt.s32.totalorder %s192_s8, %s192_s8 }
   0x6   :  { %p199_p3 = por %p198_p2, %p197_p1 }
   0x8   :  { %p200_p4 = pnand %p199_p3, %p193_p0 }
   0xa   :  { %203 = shalt.err (!%p200_p4)
}
   0xb   :  { %s229_s9 = smov 128   ;;  %s230_s10 = smov 8  }
   0xc   :  { %19 = dma.hbm_to_vmem [thread:$0]  %s276_s0, 256, %s14_s7, [#allocation3], %s229_s9, %s229_s9, %s230_s10  }
   0xd   :  { %224 = dma.done.wait [#allocation3], 256  }
   0xe   :  { %225 = vsyncadd [#allocation3], 4294967040  ;;  %v249_v0 = vld [vmem:[#allocation2] sm:$0xff]  ;;  %vm25_vm0 = vcmask 130048   ;;  %v251_v1 = vld [vmem:[#allocation2 + $0x8] sm:$0xff]  ;;  %s231_s0 = smov 16  }
   0xf   :  { %v26_v2 = vsel %vm25_vm0, %v249_v0, inf  ;;  %v40_v3 = vsel %vm25_vm0, %v249_v0, -inf  ;;  %v33_v4 = vsel %vm25_vm0, %v251_v1, inf  ;;  %v47_v5 = vsel %vm25_vm0, %v251_v1, -inf  ;;  %s232_s13 = smov 32   ;;  %s233_s14 = smov 48  }
  0x10   :  { %v27_v6 = vrot.slane %v26_v2, 4  ;;  %v41_v7 = vrot.slane %v40_v3, 4  ;;  %v34_v8 = vrot.slane %v33_v4, 4  ;;  %v48_v9 = vrot.slane %v47_v5, 4  ;;  %s234_s15 = smov 64   ;;  %s235_s16 = smov [#allocation5]  }
  0x11   :  { %v54_v10 = vsel %vm25_vm0, %v249_v0, 0.0  ;;  %v61_v11 = vsel %vm25_vm0, %v251_v1, 0.0  ;;  %vm144_vm5 = vcmask 261120   ;;  %vm147_vm6 = vcmask 392192   ;;  %s163_s17 = sshll.u32 %s235_s16, 4  ;;  %s164_s17 = int_to_ptr.vmem [resolvable:$true] %s163_s17 }
  0x12   :  { %v28_v12 = vmin.f32 %v26_v2, %v27_v6  ;;  %v42_v13 = vmax.f32 %v40_v3, %v41_v7  ;;  %v35_v14 = vmin.f32 %v33_v4, %v34_v8  ;;  %v49_v15 = vmax.f32 %v47_v5, %v48_v9  ;;  %s204_s18 = scalar_lea.vmem %s164_s17, 32  ;;  %p209_p6 = scmp.lt.s32.totalorder %s164_s17, %s164_s17 }
  0x13   :  { %v55_v16 = vrot.slane %v54_v10, 4  ;;  %v62_v17 = vrot.slane %v61_v11, 4  ;;  %vm150_vm7 = vcmask 523264   ;;  %vm155_vm8 = vcmask 647168   ;;  %p205_p5 = scmp.ne.s32.totalorder %s164_s17, %s204_s18  ;;  %p210_p7 = scmp.lt.s32.totalorder %s204_s18, %s204_s18 }
  0x14   :  { %v29_v18 = vrot.slane %v28_v12, 2  ;;  %v43_v19 = vrot.slane %v42_v13, 2  ;;  %v36_v20 = vrot.slane %v35_v14, 2  ;;  %v50_v21 = vrot.slane %v49_v15, 2 }
  0x15   :  { %v56_v22 = vadd.f32 %v55_v16, %v54_v10  ;;  %v63_v23 = vadd.f32 %v62_v17, %v61_v11  ;;  %v107_v16 = vrot.slane %v251_v1, 7  ;;  %vm153_vm9 = vcmask 654343   ;;  %p211_p8 = por %p210_p7, %p209_p6 }
  0x16   :  { %v30_v24 = vmin.f32 %v28_v12, %v29_v18  ;;  %v44_v25 = vmax.f32 %v42_v13, %v43_v19  ;;  %v37_v26 = vmin.f32 %v35_v14, %v36_v20  ;;  %v51_v27 = vmax.f32 %v49_v15, %v50_v21 }
  0x17   :  { %v57_v28 = vrot.slane %v56_v22, 2  ;;  %v64_v29 = vrot.slane %v63_v23, 2  ;;  %p212_p9 = pnand %p211_p8, %p205_p5 }
  0x18   :  { %v31_v30 = vrot.slane %v30_v24, 1  ;;  %v45_v31 = vrot.slane %v44_v25, 1  ;;  %v38_v32 = vrot.slane %v37_v26, 1  ;;  %v52_v33 = vrot.slane %v51_v27, 1 }
  0x19   :  { %v58_v34 = vadd.f32 %v57_v28, %v56_v22  ;;  %v65_v35 = vadd.f32 %v64_v29, %v63_v23 }
  0x1a   :  { %v32_v36 = vmin.f32 %v30_v24, %v31_v30  ;;  %v46_v37 = vmax.f32 %v44_v25, %v45_v31  ;;  %v39_v40 = vmin.f32 %v37_v26, %v38_v32  ;;  %v53_v41 = vmax.f32 %v51_v27, %v52_v33 }
  0x1b   :  { %v59_v38 = vrot.slane %v58_v34, 1  ;;  %v66_v39 = vrot.slane %v65_v35, 1 }
  0x1c   :  { %112 = vrot.lane.b32.xlu0 %v32_v36, %s231_s0  ;;  %120 = vrot.lane.b32.xlu1 %v46_v37, %s232_s13 }
  0x1d   :  { %v60_v42 = vadd.f32 %v59_v38, %v58_v34  ;;  %v67_v43 = vadd.f32 %v66_v39, %v65_v35 }
  0x1f   :  { %v69_v44 = vmul.f32 0.125, %v60_v42  ;;  %v70_v45 = vmul.f32 0.125, %v67_v43 }
  0x20   :  { %114 = vrot.lane.b32.xlu0 %v39_v40, %s231_s0  ;;  %122 = vrot.lane.b32.xlu1 %v53_v41, %s232_s13 }
  0x21   :  { %v71_v46 = vsub.f32 %v249_v0, %v69_v44  ;;  %v72_v47 = vsub.f32 %v251_v1, %v70_v45 }
  0x23   :  { %v73_v48 = vmul.f32 %v71_v46, %v71_v46  ;;  %v74_v49 = vmul.f32 %v72_v47, %v72_v47 }
  0x24   :  { %128 = vrot.lane.b32.xlu0 %v69_v44, %s233_s14  ;;  %130 = vrot.lane.b32.xlu1 %v70_v45, %s233_s14 }
  0x25   :  { %v75_v50 = vsel %vm25_vm0, %v73_v48, 0.0  ;;  %v82_v51 = vsel %vm25_vm0, %v74_v49, 0.0 }
  0x26   :  { %v76_v52 = vrot.slane %v75_v50, 4  ;;  %v83_v53 = vrot.slane %v82_v51, 4 }
  0x28   :  { %v77_v54 = vadd.f32 %v76_v52, %v75_v50  ;;  %v84_v55 = vadd.f32 %v83_v53, %v82_v51 }
  0x2a   :  { %v78_v56 = vrot.slane %v77_v54, 2  ;;  %v85_v57 = vrot.slane %v84_v55, 2 }
  0x2c   :  { %v79_v58 = vadd.f32 %v78_v56, %v77_v54  ;;  %v86_v59 = vadd.f32 %v85_v57, %v84_v55 }
  0x2e   :  { %v80_v60 = vrot.slane %v79_v58, 1  ;;  %v87_v61 = vrot.slane %v86_v59, 1 }
  0x30   :  { %v81_v62 = vadd.f32 %v80_v60, %v79_v58  ;;  %v88_v63 = vadd.f32 %v87_v61, %v86_v59 }
  0x32   :  { %v89_v2 = vmul.f32 0.125, %v81_v62  ;;  %v90_v3 = vmul.f32 0.125, %v88_v63 }
  0x34   :  { %180 = vrsqrt.f32 %v90_v3  ;;  %vm100_vm1 = vcmp.eq.f32.partialorder %v90_v3, inf  ;;  %v103_v5 = vand.u32 2147483648, %v90_v3  ;;  %vm102_vm2 = vcmp.eq.f32.partialorder %v90_v3, 0.0 }
  0x35   :  { %182 = vrsqrt.f32 %v89_v2  ;;  %vm93_vm3 = vcmp.eq.f32.partialorder %v89_v2, inf  ;;  %v96_v8 = vand.u32 2147483648, %v89_v2  ;;  %vm95_vm4 = vcmp.eq.f32.partialorder %v89_v2, 0.0 }
  0x41   :  { %v181_v4 = vpop.eup %180 }
  0x42   :  { %v183_v6 = vpop.eup %182  ;;  %v99_v7 = vmul.f32 %v181_v4, %v90_v3 }
  0x43   :  { %v92_v9 = vmul.f32 %v183_v6, %v89_v2 }
  0x44   :  { %v101_v10 = vsel %vm100_vm1, %v90_v3, %v99_v7 }
  0x45   :  { %v104_v11 = vsel %vm102_vm2, %v103_v5, %v101_v10  ;;  %v94_v12 = vsel %vm93_vm3, %v89_v2, %v92_v9 }
  0x46   :  { %138 = vrot.lane.b32.xlu1 %v104_v11, %s234_s15  ;;  %v97_v13 = vsel %vm95_vm4, %v96_v8, %v94_v12 }
  0x47   :  { %136 = vrot.lane.b32.xlu0 %v97_v13, %s234_s15 }
  0x8e   :  { %v121_v14 = vpop.permute.xlu1 %120  ;;  %v113_v15 = vpop.permute.xlu0 %112 }
  0x8f   :  { %v142_v20 = vsel %vm25_vm0, %v249_v0, %v113_v15 }
  0x90   :  { %v145_v24 = vsel %vm144_vm5, %v142_v20, %v121_v14 }
  0x92   :  { %v123_v17 = vpop.permute.xlu1 %122  ;;  %v115_v18 = vpop.permute.xlu0 %114 }
  0x93   :  { %v143_v19 = vsel %vm25_vm0, %v107_v16, %v115_v18 }
  0x94   :  { %v146_v22 = vsel %vm144_vm5, %v143_v19, %v123_v17 }
  0x96   :  { %v131_v21 = vpop.permute.xlu1 %130  ;;  %v129_v23 = vpop.permute.xlu0 %128 }
  0x97   :  { %v149_v25 = vsel %vm147_vm6, %v146_v22, %v131_v21  ;;  %v148_v1 = vsel %vm147_vm6, %v145_v24, %v129_v23 }
  0xb8   :  { %v139_v26 = vpop.permute.xlu1 %138 }
  0xb9   :  { %v152_v27 = vsel %vm150_vm7, %v149_v25, %v139_v26  ;;  %v137_v28 = vpop.permute.xlu0 %136 }
  0xba   :  { %v151_v29 = vsel %vm150_vm7, %v148_v1, %v137_v28  ;;  %156 = vst.msk [vmem:[#allocation5 + $0x1] sm:$0x1] %vm155_vm8, %v152_v27 }
  0xbb   :  { %154 = vst.msk [vmem:[#allocation5 - $0x7] sm:$0x80] %vm153_vm9, %v151_v29 }
  0xbc   :  { %215 = shalt.err (!%p212_p9)
}
  0xbd   :  { %166 = dma.vmem_to_hbm [thread:$0]  %s164_s17, 32, %s277_s1, [#allocation4]  }
  0xbe   :  { %226 = dma.done.wait [#allocation4], 32  }
  0xbf   :  { %227 = vsyncadd [#allocation4], 4294967264 }
  0xc0   :  { %170 = vsyncpa [#allocation3], 1 }
  0xc1   :  { %171 = vsyncpa [#allocation4], 1 }

</bundles_post_ra>
